<compile_context>
chip_gen: v7x
topology: tpu7x:2x2x1
jax: 0.10.0
libtpu: 0.0.40
codegen_flags: <defaults>
</compile_context>

<pallas_src>
import functools

import jax
import jax.numpy as jnp
from jax.experimental import pallas as pl
from jax.experimental.pallas import tpu as pltpu

EPS = 1e-12  # matches torch.nn.functional.normalize default


def _round_up(v, m):
    return ((v + m - 1) // m) * m


def _cosine_kernel(x_ref, w_ref, inv_xn_ref, inv_wn_ref, o_ref, *, mxu_dtype):
    # Raw (un-normalized) tiles; cast to the MXU-native dtype, accumulate in f32.
    x = x_ref[...].astype(mxu_dtype)            # (TM, F)
    w = w_ref[...].astype(mxu_dtype)            # (TC, F)
    # Contract the shared F axis of both operands (no transpose needed).
    s = jax.lax.dot_general(
        x, w,
        dimension_numbers=(((1,), (1,)), ((), ())),
        preferred_element_type=jnp.float32,
    )                                            # (TM, TC) f32
    # Scale rows by 1/||x_i|| and columns by 1/||W_j||  (O(TM*TC) VPU work).
    o_ref[...] = (s * inv_xn_ref[...] * inv_wn_ref[...]).astype(o_ref.dtype)


def cosine_layer(x, weights, *, mxu_dtype=jnp.bfloat16):
    """x: (N, F), weights: (C, F) -> (N, C) float32 cosine similarities."""
    N, F = x.shape
    C, F2 = weights.shape
    assert F == F2, "feature_size mismatch"

    xf = x.astype(jnp.float32)
    wf = weights.astype(jnp.float32)

    # 1 / max(||v||_2, eps) == rsqrt(max(sum(v^2), eps^2))  (sqrt is monotone).
    inv_xn = jax.lax.rsqrt(
        jnp.maximum(jnp.sum(xf * xf, axis=-1, keepdims=True), EPS * EPS))       # (N, 1)
    inv_wn = jax.lax.rsqrt(
        jnp.maximum(jnp.sum(wf * wf, axis=-1, keepdims=True), EPS * EPS)).T     # (1, C)

    # Tile sizes: multiples of (8, 128); lane-dense output (TC % 128 == 0).
    TM = min(256, _round_up(N, 8))
    TC = min(512, _round_up(C, 128))
    N_pad = _round_up(N, TM)
    C_pad = _round_up(C, TC)

    def pad2(a, rows, cols):
        pr, pc = rows - a.shape[0], cols - a.shape[1]
        return jnp.pad(a, ((0, pr), (0, pc))) if (pr or pc) else a

    # Zero padding is safe: padded rows/cols produce exact zeros (0 * inv = 0)
    # and are sliced off before returning.
    x_p = pad2(xf, N_pad, F)
    w_p = pad2(wf, C_pad, F)
    inv_xn_p = pad2(inv_xn, N_pad, 1)
    inv_wn_p = pad2(inv_wn, 1, C_pad)

    grid = (N_pad // TM, C_pad // TC)

    out = pl.pallas_call(
        functools.partial(_cosine_kernel, mxu_dtype=mxu_dtype),
        out_shape=jax.ShapeDtypeStruct((N_pad, C_pad), jnp.float32),
        grid_spec=pltpu.PrefetchScalarGridSpec(
            num_scalar_prefetch=0,
            grid=grid,
            in_specs=[
                pl.BlockSpec((TM, F), lambda i, j: (i, 0)),   # x tile
                pl.BlockSpec((TC, F), lambda i, j: (j, 0)),   # W tile
                pl.BlockSpec((TM, 1), lambda i, j: (i, 0)),   # 1/||x_i||
                pl.BlockSpec((1, TC), lambda i, j: (0, j)),   # 1/||W_j||
            ],
            out_specs=pl.BlockSpec((TM, TC), lambda i, j: (i, j)),
        ),
        compiler_params=pltpu.CompilerParams(
            dimension_semantics=("parallel", "parallel")),
    )(x_p, w_p, inv_xn_p, inv_wn_p)

    return out[:N, :C]


def xavier_uniform(key, shape, dtype=jnp.float32):
    # nn.init.xavier_uniform_ for a (fan_out, fan_in) linear weight.
    fan_out, fan_in = shape
    bound = jnp.sqrt(6.0 / (fan_in + fan_out))
    return jax.random.uniform(key, shape, dtype, minval=-bound, maxval=bound)


if __name__ == "__main__":
    key = jax.random.PRNGKey(0)
    k_x, k_w = jax.random.split(key)

    N = 8               # batch
    feature_size = 32
    num_classes = 16

    x = jax.random.normal(k_x, (N, feature_size), dtype=jnp.float32)
    weights = xavier_uniform(k_w, (num_classes, feature_size))

    # Plain-JAX reference (exact f32 semantics of the PyTorch module).
    x_n = x / jnp.maximum(jnp.linalg.norm(x, axis=-1, keepdims=True), EPS)
    w_n = weights / jnp.maximum(jnp.linalg.norm(weights, axis=-1, keepdims=True), EPS)
    ref = x_n @ w_n.T

    # Default (bf16 MXU operands, f32 accumulation) — fast path for v6e/v7x.
    out = jax.block_until_ready(cosine_layer(x, weights))
    assert out.shape == (N, num_classes)
    assert jnp.allclose(out, ref, atol=2e-2, rtol=0.0), "mismatch vs reference (bf16 path)"

    # Full-precision path sanity check.
    out_f32 = jax.block_until_ready(cosine_layer(x, weights, mxu_dtype=jnp.float32))
    assert jnp.allclose(out_f32, ref, atol=1e-4, rtol=1e-4), "mismatch vs reference (f32 path)"

    print("KERNEL_OK")
</pallas_src>

<mosaic_0001>
module attributes {stable_mosaic.version = 11 : i64} {
  func.func @_cosine_kernel(%arg0: i32, %arg1: i32, %arg2: memref<8x32xf32, #tpu.memory_space<vmem>>, %arg3: memref<128x32xf32, #tpu.memory_space<vmem>>, %arg4: memref<8x1xf32, #tpu.memory_space<vmem>>, %arg5: memref<1x128xf32, #tpu.memory_space<vmem>>, %arg6: memref<8x128xf32, #tpu.memory_space<vmem>>) attributes {dimension_semantics = [#tpu.dimension_semantics<parallel>, #tpu.dimension_semantics<parallel>], iteration_bounds = array<i64: 1, 1>, scalar_prefetch = 0 : i64, scratch_operands = 0 : i64, tpu.core_type = #tpu.core_type<tc>, window_params = [{transform_indices = @transform_0, window_bounds = array<i64: 8, 32>}, {transform_indices = @transform_1, window_bounds = array<i64: 128, 32>}, {transform_indices = @transform_2, window_bounds = array<i64: 8, 1>}, {transform_indices = @transform_3, window_bounds = array<i64: 1, 128>}, {transform_indices = @transform_4, window_bounds = array<i64: 8, 128>}]} {
    %c0 = arith.constant 0 : index
    %c0_0 = arith.constant 0 : index
    %0 = vector.load %arg2[%c0, %c0_0] : memref<8x32xf32, #tpu.memory_space<vmem>>, vector<8x32xf32>
    %1 = arith.truncf %0 : vector<8x32xf32> to vector<8x32xbf16>
    %c0_1 = arith.constant 0 : index
    %c0_2 = arith.constant 0 : index
    %2 = vector.load %arg3[%c0_1, %c0_2] : memref<128x32xf32, #tpu.memory_space<vmem>>, vector<128x32xf32>
    %3 = arith.truncf %2 : vector<128x32xf32> to vector<128x32xbf16>
    %cst = arith.constant dense<0.000000e+00> : vector<8x128xf32>
    %4 = tpu.matmul %1, %3, %cst {dimension_numbers = #tpu.dot_dimension_numbers<[1], [1], [0], [0], [0, 0, 1, 0], [], []>} : vector<8x32xbf16>, vector<128x32xbf16>, vector<8x128xf32> -> vector<8x128xf32>
    %c0_3 = arith.constant 0 : index
    %c0_4 = arith.constant 0 : index
    %5 = vector.load %arg4[%c0_3, %c0_4] : memref<8x1xf32, #tpu.memory_space<vmem>>, vector<8x1xf32>
    %6 = vector.broadcast %5 : vector<8x1xf32> to vector<8x128xf32>
    %7 = arith.mulf %4, %6 : vector<8x128xf32>
    %c0_5 = arith.constant 0 : index
    %c0_6 = arith.constant 0 : index
    %8 = vector.load %arg5[%c0_5, %c0_6] : memref<1x128xf32, #tpu.memory_space<vmem>>, vector<1x128xf32>
    %9 = vector.broadcast %8 : vector<1x128xf32> to vector<8x128xf32>
    %10 = arith.mulf %7, %9 : vector<8x128xf32>
    %c0_7 = arith.constant 0 : index
    %c0_8 = arith.constant 0 : index
    %11 = vector.load %arg6[%c0_7, %c0_8] : memref<8x128xf32, #tpu.memory_space<vmem>>, vector<8x128xf32>
    tpu.vector_store %arg6[%c0_7, %c0_8], %10 {strides = array<i32>} : memref<8x128xf32, #tpu.memory_space<vmem>>, vector<8x128xf32>,
    return
  }
  func.func @transform_0(%arg0: i32, %arg1: i32) -> (i32, i32) {
    %c0_i32 = arith.constant 0 : i32
    %c0_i32_0 = arith.constant 0 : i32
    return %arg0, %c0_i32 : i32, i32
  }
  func.func @transform_1(%arg0: i32, %arg1: i32) -> (i32, i32) {
    %c0_i32 = arith.constant 0 : i32
    %c0_i32_0 = arith.constant 0 : i32
    return %arg1, %c0_i32 : i32, i32
  }
  func.func @transform_2(%arg0: i32, %arg1: i32) -> (i32, i32) {
    %c0_i32 = arith.constant 0 : i32
    %c0_i32_0 = arith.constant 0 : i32
    return %arg0, %c0_i32 : i32, i32
  }
  func.func @transform_3(%arg0: i32, %arg1: i32) -> (i32, i32) {
    %c0_i32 = arith.constant 0 : i32
    %c0_i32_0 = arith.constant 0 : i32
    return %c0_i32, %arg1 : i32, i32
  }
  func.func @transform_4(%arg0: i32, %arg1: i32) -> (i32, i32) {
    %c0_i32 = arith.constant 0 : i32
    return %arg0, %arg1 : i32, i32
  }
}

</mosaic_0001>

<bundles_post_ra>
// kernel: tpu_custom_call.1
= control target key start
LH: loop header
LB: loop body
LE: loop exit
PB: predicated region body
PF: predicated region fallthrough
CT: control target
= control target key end

     0   :  { %vm45_vm0 = vcmask 261120   ;;  %v203_v2 = vmov 0.0   ;;  %vm204_vm1 = vmmov 0   ;;  %v205_v6 = vmov 0   ;;  %s310_s0 = inlined_call_operand.vmem [shape: f32[8,32], index: 0, kind: input, shape index: {}]   ;;  %s311_s1 = inlined_call_operand.vmem [shape: f32[128,32], index: 1, kind: input, shape index: {}]   ;;  %s312_s2 = inlined_call_operand.vmem [shape: f32[8,1], index: 2, kind: input, shape index: {}]   ;;  %s313_s3 = inlined_call_operand.vmem [shape: f32[1,128], index: 3, kind: input, shape index: {}]   ;;  %s314_s4 = inlined_call_operand.hbm [shape: f32[8,128], index: 4, kind: output, shape index: {}]  }
   0x1   :  { %v21_v0 = vld [vmem:[%s311_s1] sm:$0xff]  ;;  %v22_v1 = vld [vmem:[%s311_s1 + $0x8] sm:$0xff]  ;;  %154 = vmatprep.subr.bf16.mxu0 %v203_v2  ;;  %170 = vmatprep.mubr.msk.bf16.mxu0 %vm204_vm1, %v203_v2  ;;  %v23_v4 = vld [vmem:[%s311_s1 + $0x10] sm:$0xff] }
   0x2   :  { %v37_v3 = vpack.c.bf16 %v22_v1, %v21_v0  ;;  %v24_v5 = vld [vmem:[%s311_s1 + $0x18] sm:$0xff]  ;;  %178 = vset.pattern.permute.xlu0 %v205_v6  ;;  %v113_v9 = vld [vmem:[%s312_s2] sm:$0xff] }
   0x3   :  { %v38_v8 = vpack.c.bf16 %v24_v5, %v23_v4  ;;  %116 = vperm.xlu0 %178, %v113_v9  }
   0x4   :  { %v50_v7 = vsel %vm45_vm0, %v37_v3, 0 }
   0x5   :  { %155 = vmatpush3.bf16.xpose.msra.mxu0 %v50_v7 }
   0x6   :  { %156 = vmatprep.subr.bf16.mxu0 %v203_v2 }
   0x7   :  { %9 = vsyncpa [#allocation3], 0  ;;  %v53_v10 = vsel %vm45_vm0, %v38_v8, 0  ;;  %v25_v11 = vld [vmem:[%s311_s1 + $0x20] sm:$0xff]  ;;  %v26_v12 = vld [vmem:[%s311_s1 + $0x28] sm:$0xff] }
   0x8   :  { %v39_v13 = vpack.c.bf16 %v26_v12, %v25_v11  ;;  %v27_v15 = vld [vmem:[%s311_s1 + $0x30] sm:$0xff]  ;;  %v28_v16 = vld [vmem:[%s311_s1 + $0x38] sm:$0xff]  ;;  %v29_v19 = vld [vmem:[%s311_s1 + $0x40] sm:$0xff] }
   0x9   :  { %v40_v17 = vpack.c.bf16 %v28_v16, %v27_v15  ;;  %v30_v20 = vld [vmem:[%s311_s1 + $0x48] sm:$0xff]  ;;  %v31_v23 = vld [vmem:[%s311_s1 + $0x50] sm:$0xff]  ;;  %v32_v24 = vld [vmem:[%s311_s1 + $0x58] sm:$0xff] }
   0xa   :  { %v56_v14 = vsel %vm45_vm0, %v39_v13, 0  ;;  %v41_v21 = vpack.c.bf16 %v30_v20, %v29_v19  ;;  %v42_v25 = vpack.c.bf16 %v32_v24, %v31_v23  ;;  %v33_v27 = vld [vmem:[%s311_s1 + $0x60] sm:$0xff]  ;;  %v34_v28 = vld [vmem:[%s311_s1 + $0x68] sm:$0xff]  ;;  %v35_v31 = vld [vmem:[%s311_s1 + $0x70] sm:$0xff] }
   0xb   :  { %v59_v18 = vsel %vm45_vm0, %v40_v17, 0  ;;  %v43_v29 = vpack.c.bf16 %v34_v28, %v33_v27  ;;  %v36_v32 = vld [vmem:[%s311_s1 + $0x78] sm:$0xff]  ;;  %v19_v35 = vld [vmem:[%s310_s0] sm:$0xff]  ;;  %s206_s1 = smov [#allocation2]  }
   0xc   :  { %v62_v22 = vsel %vm45_vm0, %v41_v21, 0  ;;  %v65_v26 = vsel %vm45_vm0, %v42_v25, 0  ;;  %v44_v33 = vpack.c.bf16 %v36_v32, %v35_v31  ;;  %v20_v36 = vpack.c.bf16 %v19_v35, %v19_v35  ;;  %v144_v39 = vld [vmem:[%s313_s3] ss:$0 sm:$0xff]  ;;  %s135_s26 = sshll.u32 %s206_s1, 4  ;;  %s136_s26 = int_to_ptr.vmem [resolvable:$true] %s135_s26 }
   0xd   :  { %157 = vmatpush3.bf16.xpose.msra.mxu0 %v53_v10  ;;  %v68_v30 = vsel %vm45_vm0, %v43_v29, 0  ;;  %s179_s27 = scalar_lea.vmem %s136_s26, 128  ;;  %p184_p1 = scmp.lt.s32.totalorder %s136_s26, %s136_s26 }
   0xe   :  { %158 = vmatprep.subr.bf16.mxu0 %v203_v2  ;;  %v71_v34 = vsel %vm45_vm0, %v44_v33, 0  ;;  %p180_p0 = scmp.ne.s32.totalorder %s136_s26, %s179_s27  ;;  %p185_p2 = scmp.lt.s32.totalorder %s179_s27, %s179_s27 }
  0x10   :  { %p186_p3 = por %p185_p2, %p184_p1 }
  0x12   :  { %p187_p4 = pnand %p186_p3, %p180_p0 }
  0x15   :  { %159 = vmatpush3.bf16.xpose.msra.mxu0 %v56_v14 }
  0x16   :  { %160 = vmatprep.subr.bf16.mxu0 %v203_v2 }
  0x1d   :  { %161 = vmatpush3.bf16.xpose.msra.mxu0 %v59_v18 }
  0x1e   :  { %162 = vmatprep.subr.bf16.mxu0 %v203_v2 }
  0x25   :  { %163 = vmatpush3.bf16.xpose.msra.mxu0 %v62_v22 }
  0x26   :  { %164 = vmatprep.subr.bf16.mxu0 %v203_v2 }
  0x2d   :  { %165 = vmatpush3.bf16.xpose.msra.mxu0 %v65_v26 }
  0x2e   :  { %166 = vmatprep.subr.bf16.mxu0 %v203_v2 }
  0x35   :  { %167 = vmatpush3.bf16.xpose.msra.mxu0 %v68_v30 }
  0x36   :  { %168 = vmatprep.subr.bf16.mxu0 %v203_v2 }
  0x3d   :  { %169 = vmatpush3.bf16.xpose.msra.mxu0 %v71_v34 }
  0x44   :  { %171 = vmatmul.mubr.msk.bf16.vlgmr.msra.gmra.mrb[0].mxu0 %vm45_vm0, %v20_v36 }
  0x82   :  { %v117_v37 = vpop.permute.xlu0 %116 }
 0x117   :  { %v107_v38 = vpop.f32.mrb[0].mxu0 }
 0x118   :  { %v119_v40 = vmul.f32 %v117_v37, %v107_v38  ;;  %v172_v41 = vpop.f32.mrb[1].mxu0 }
 0x119   :  { %v110_v42 = vpop.f32.mrb[2].mxu0 }
 0x11a   :  { %v173_v43 = vpop.f32.mrb[3].mxu0  ;;  %v127_v44 = vmul.f32 %v144_v39, %v119_v40 }
 0x11c   :  { %128 = vst [vmem:[#allocation2] sm:$0xff] %v127_v44 }
 0x11d   :  { %190 = shalt.err (!%p187_p4)
}
 0x11e   :  { %s191_s3 = scalar_lea.hbm %s314_s4, 128 }
 0x11f   :  { %p192_p5 = scmp.ne.s32.totalorder %s314_s4, %s191_s3  ;;  %p195_p6 = scmp.lt.u32.totalorder %s191_s3, %s314_s4 }
 0x121   :  { %p197_p7 = pnand %p195_p6, %p192_p5 }
 0x123   :  { %200 = shalt.err (!%p197_p7)
}
 0x124   :  { %138 = dma.vmem_to_hbm [thread:$0]  %s136_s26, 128, %s314_s4, [#allocation3]  }
 0x125   :  { %201 = dma.done.wait [#allocation3], 128  }
 0x126   :  { %202 = vsyncadd [#allocation3], 4294967168 }
 0x127   :  { %142 = vsyncpa [#allocation3], 1 }

</bundles_post_ra>
